<compile_context>
chip_gen: v7x
topology: tpu7x:2x2x1
jax: 0.10.0
libtpu: 0.0.40
codegen_flags: <defaults>
</compile_context>

<pallas_src>
import functools

import numpy as np
import jax
import jax.numpy as jnp
from jax.experimental import pallas as pl
from jax.experimental.pallas import tpu as pltpu


# ---------------------------------------------------------------------------
# Fused whole-forward kernel
# ---------------------------------------------------------------------------
def _aggregate_ved_kernel(x_ref, m_ref, w_ref, b_ref, out_ref, *,
                          k_sizes, n_ce, n_pe, n_dec_rest,
                          batch, bps_dim, latent_dim):
    """Entire Aggregate_VED forward on one VMEM-resident slab.

    Inputs:
      x_ref : (B*T, choir_dim*bps)  f32    flattened input frames
      m_ref : (2B, B*T)             f32    rows [0:B): mean over first T-1 frames,
                                           rows [B:2B): last-frame selector
      w_ref : (K_total, 128)        bf16   packed, 128-lane-padded weight slab
      b_ref : (n_biases, 128)       f32    packed bias slab (one row per layer)
    Output:
      out_ref : (B, 128) f32  [ dist(bps) | p_mu(L) | p_var(L) | 0 ]
    """
    # Static row offsets of each weight block inside the slab.
    offs = []
    acc = 0
    for k in k_sizes:
        offs.append(acc)
        acc += k

    wi = [0]
    bi = [0]

    def wblk():
        i = wi[0]
        wi[0] += 1
        return w_ref[offs[i]:offs[i] + k_sizes[i], :]          # (k,128) bf16, static slice

    def bias():
        i = bi[0]
        bi[0] += 1
        return b_ref[i:i + 1, :]                               # (1,128) f32

    def dot(a, w):
        # bf16 x bf16 MXU matmul, f32 accumulation.
        return jnp.dot(a.astype(jnp.bfloat16), w, preferred_element_type=jnp.float32)

    def lin(h):
        return dot(h, wblk()) + bias()

    # ---- choir encoder: (Linear+BN folded) [- x_prev for i>0] -> ReLU, then embedding
    h = x_ref[...]
    h_prev = None
    for i in range(n_ce):
        y = lin(h)
        if i > 0:
            y = y - h_prev                 # residual_connections: x -= x_prev (pre-ReLU)
        h = jnp.maximum(y, 0.0)
        h_prev = h
    emb = lin(h)                           # choir embedding, lanes [0:E), others 0

    # ---- prior encoder (computed on all B*T rows; last-frame rows stay finite and
    #      receive zero weight in the mean -> mathematically identical to reference)
    p = emb
    for _ in range(n_pe):
        p = jnp.maximum(lin(p), 0.0)
    s = lin(p)                             # head: mu @ lanes [bps:bps+L), lv @ [bps+L:bps+2L)

    m = m_ref[...]
    # Mean over first T-1 frames / last-frame selection as tiny f32 matmuls.
    agg = jnp.dot(m[0:batch, :], s, preferred_element_type=jnp.float32)        # (B,128)
    emb_last = jnp.dot(m[batch:2 * batch, :], emb, preferred_element_type=jnp.float32)

    # ---- decoder: dec_input = [z, emb_last]; shared z_linear skip for i > 0
    # z = p_mu lives in agg lanes [bps:bps+L); the z-consuming weight blocks have
    # zero rows everywhere else, so agg can be used directly (no lane slicing).
    zproj = lin(agg)                       # z_linear(z), lanes [0:d0)
    d = jnp.maximum(dot(agg, wblk()) + dot(emb_last, wblk()) + bias(), 0.0)
    for _ in range(n_dec_rest):
        d = jnp.maximum(lin(d) + zproj, 0.0)        # skip connection, pre-ReLU
    dist_raw = lin(d)                      # decoder output, lanes [0:bps)

    # ---- single lane-dense packed output: [dist | p_mu | p_var | 0]
    lane = jax.lax.broadcasted_iota(jnp.int32, out_ref.shape, 1)
    p_var_full = 0.1 + 0.9 * jax.nn.sigmoid(agg)    # valid at the log_var lanes
    out = jnp.where(lane < bps_dim, jax.nn.sigmoid(dist_raw),          # remapped dists
          jnp.where(lane < bps_dim + latent_dim, agg,                  # p_mu
          jnp.where(lane < bps_dim + 2 * latent_dim, p_var_full, 0.0)))
    out_ref[...] = out                     # one full 128-lane store


# ---------------------------------------------------------------------------
# Deterministic raw parameters (shapes per the module's __init__)
# ---------------------------------------------------------------------------
def _linear_params(key, fan_in, fan_out):
    kw, kb = jax.random.split(key)
    bound = 1.0 / (fan_in ** 0.5)
    w = jax.random.uniform(kw, (fan_in, fan_out), jnp.float32, -bound, bound)
    b = jax.random.uniform(kb, (fan_out,), jnp.float32, -bound, bound)
    return w, b


def _bn_params(key, dim, eps=1e-5):
    k1, k2, k3, k4 = jax.random.split(key, 4)
    gamma = 1.0 + 0.1 * jax.random.normal(k1, (dim,), jnp.float32)
    beta = 0.1 * jax.random.normal(k2, (dim,), jnp.float32)
    mean = 0.1 * jax.random.normal(k3, (dim,), jnp.float32)
    var = 0.5 + 0.1 * jnp.abs(jax.random.normal(k4, (dim,), jnp.float32))
    scale = gamma / jnp.sqrt(var + eps)      # eval-mode BN -> per-feature affine
    shift = beta - mean * scale
    return scale, shift


def init_params(key, *, bps_dim=16, choir_dim=2, choir_encoder_dims=(64, 64),
                encoder_layer_dims=(64, 64), decoder_layer_dims=(64, 64),
                choir_embedding_dim=64, latent_dim=32):
    keys = iter(jax.random.split(key, 64))
    p = {}

    dims = [choir_dim * bps_dim] + list(choir_encoder_dims)
    p["choir_enc"] = [_linear_params(next(keys), dims[i], dims[i + 1])
                      for i in range(len(choir_encoder_dims))]
    p["choir_enc"].append(
        _linear_params(next(keys), choir_encoder_dims[-1], choir_embedding_dim))
    p["choir_enc_bn"] = [_bn_params(next(keys), d) for d in choir_encoder_dims]

    edims = [choir_embedding_dim] + list(encoder_layer_dims)
    p["prior"] = [_linear_params(next(keys), edims[i], edims[i + 1])
                  for i in range(len(encoder_layer_dims))]
    p["prior"].append(
        _linear_params(next(keys), encoder_layer_dims[-1], 2 * latent_dim))
    p["prior_bn"] = [_bn_params(next(keys), d) for d in encoder_layer_dims]

    # frame_to_predict='last' -> decoder first layer sees latent + embedding
    ddims = [latent_dim + choir_embedding_dim] + list(decoder_layer_dims)
    p["dec"] = [_linear_params(next(keys), ddims[i], ddims[i + 1])
                for i in range(len(decoder_layer_dims))]
    p["dec"].append(_linear_params(next(keys), decoder_layer_dims[-1], bps_dim))
    p["dec_bn"] = [_bn_params(next(keys), d) for d in decoder_layer_dims]

    # decoder_all_same_dim=True -> single shared z_linear: Linear(latent, d0)
    p["z_linear"] = _linear_params(next(keys), latent_dim, decoder_layer_dims[0])
    return p


# ---------------------------------------------------------------------------
# Fold eval-mode BN into the Linears and pack into two kernel slabs
# ---------------------------------------------------------------------------
def _fold(w, b, scale, shift):
    return w * scale[None, :], b * scale + shift


def fold_and_pack(raw, *, bps_dim, latent_dim, choir_in_dim, pad=128):
    """Returns (w_slab bf16 (K_total,128), b_slab f32 (n_biases,128), meta dict)."""
    assert bps_dim + 2 * latent_dim <= pad, "packed output must fit in 128 lanes"
    mu0 = bps_dim                       # lane offset of p_mu in agg / packed output
    lv0 = bps_dim + latent_dim          # lane offset of log_var

    w_blocks, b_rows, k_sizes = [], [], []

    def add_w(k, w_np, row0=0, col0=0):
        blk = np.zeros((k, pad), np.float32)
        blk[row0:row0 + w_np.shape[0], col0:col0 + w_np.shape[1]] = w_np
        w_blocks.append(blk)
        k_sizes.append(k)

    def add_b(b_np, col0=0):
        row = np.zeros((pad,), np.float32)
        row[col0:col0 + b_np.shape[0]] = b_np
        b_rows.append(row)

    # -- choir encoder loop layers (BN folded); first layer contracts the raw input
    for li, ((w, b), (sc, sh)) in enumerate(zip(raw["choir_enc"][:-1],
                                                raw["choir_enc_bn"])):
        wf, bf = _fold(w, b, sc, sh)
        add_w(choir_in_dim if li == 0 else pad, np.asarray(wf))
        add_b(np.asarray(bf))
    # -- choir embedding layer (no BN/ReLU)
    we, be = map(np.asarray, raw["choir_enc"][-1])
    add_w(pad, we)
    add_b(be)
    # -- prior encoder loop layers (BN folded)
    for (w, b), (sc, sh) in zip(raw["prior"][:-1], raw["prior_bn"]):
        wf, bf = _fold(w, b, sc, sh)
        add_w(pad, np.asarray(wf))
        add_b(np.asarray(bf))
    # -- prior head, UNSPLIT: mu placed at cols [mu0:mu0+L), log_var at [lv0:lv0+L)
    wh, bh = map(np.asarray, raw["prior"][-1])
    blk = np.zeros((pad, pad), np.float32)
    blk[:wh.shape[0], mu0:mu0 + latent_dim] = wh[:, :latent_dim]
    blk[:wh.shape[0], lv0:lv0 + latent_dim] = wh[:, latent_dim:]
    w_blocks.append(blk)
    k_sizes.append(pad)
    brow = np.zeros((pad,), np.float32)
    brow[mu0:mu0 + latent_dim] = bh[:latent_dim]
    brow[lv0:lv0 + latent_dim] = bh[latent_dim:]
    b_rows.append(brow)
    # -- shared z_linear: consumes packed agg -> z rows live at [mu0:mu0+L)
    wz, bz = map(np.asarray, raw["z_linear"])
    add_w(pad, wz, row0=mu0)
    add_b(bz)
    # -- decoder layer 0 (BN folded), split into z-part and emb-part blocks
    (w0, b0), (sc0, sh0) = raw["dec"][0], raw["dec_bn"][0]
    w0f, b0f = _fold(w0, b0, sc0, sh0)
    w0f, b0f = np.asarray(w0f), np.asarray(b0f)
    add_w(pad, w0f[:latent_dim], row0=mu0)   # z part (reads agg's p_mu lanes)
    add_w(pad, w0f[latent_dim:])             # emb_last part (reads lanes [0:E))
    add_b(b0f)
    # -- remaining decoder hidden layers (BN folded)
    for (w, b), (sc, sh) in zip(raw["dec"][1:-1], raw["dec_bn"][1:]):
        wf, bf = _fold(w, b, sc, sh)
        add_w(pad, np.asarray(wf))
        add_b(np.asarray(bf))
    # -- decoder output layer -> cols [0:bps)
    wd, bd = map(np.asarray, raw["dec"][-1])
    add_w(pad, wd)
    add_b(bd)

    w_slab = jnp.asarray(np.concatenate(w_blocks, axis=0), dtype=jnp.bfloat16)
    b_slab = jnp.asarray(np.stack(b_rows, axis=0), dtype=jnp.float32)
    meta = dict(k_sizes=tuple(k_sizes),
                n_ce=len(raw["choir_enc"]) - 1,
                n_pe=len(raw["prior"]) - 1,
                n_dec_rest=len(raw["dec"]) - 2,
                bps_dim=bps_dim, latent_dim=latent_dim, pad=pad)
    return w_slab, b_slab, meta


# ---------------------------------------------------------------------------
# Forward pass (y=None, use_mean=True) -- one pallas_call + trivial glue
# ---------------------------------------------------------------------------
def aggregate_ved_forward(meta, w_slab, b_slab, x):
    B, T, P, C = x.shape
    assert meta["bps_dim"] == P, "decoder output dim must equal bps_dim (= P)"
    x2d = x.reshape(B * T, P * C).astype(jnp.float32)

    # Packed constant frame-aggregation matrix (built at trace time):
    #   rows [0:B)  : mean over the first T-1 frames of each batch element
    #   rows [B:2B) : selector for each batch element's last frame
    m = np.zeros((2 * B, B * T), np.float32)
    for b in range(B):
        m[b, b * T:b * T + T - 1] = 1.0 / (T - 1)
        m[B + b, b * T + T - 1] = 1.0
    m = jnp.asarray(m)

    kernel = functools.partial(
        _aggregate_ved_kernel,
        k_sizes=meta["k_sizes"], n_ce=meta["n_ce"], n_pe=meta["n_pe"],
        n_dec_rest=meta["n_dec_rest"], batch=B,
        bps_dim=meta["bps_dim"], latent_dim=meta["latent_dim"])

    # Single grid step: x, aggregation matrix, weight slab and bias slab are
    # four whole-array VMEM-resident operands (4 input DMAs, 1 output DMA).
    out = pl.pallas_call(
        kernel,
        out_shape=jax.ShapeDtypeStruct((B, meta["pad"]), jnp.float32),
        compiler_params=pltpu.CompilerParams(vmem_limit_bytes=32 * 1024 * 1024),
    )(x2d, m, w_slab, b_slab)

    L = meta["latent_dim"]
    dist = out[:, :P]                       # (B, P)
    p_mu = out[:, P:P + L]                  # (B, L)
    p_var = out[:, P + L:P + 2 * L]         # (B, L)

    # choir = cat([last_frame[...,0:1], dist[...,None]], -1); the (P,2) interleave
    # is lane-hostile (width-2 last dim), so this tiny stack stays in the wrapper.
    choir = jnp.stack([x[:, -1, :, 0], dist], axis=-1)       # (B, P, 2)
    return {"choir": choir, "orientations": None, "mano": None,
            "prior": (p_mu, p_var), "posterior": (None, None)}


# ---------------------------------------------------------------------------
# Pure-JAX reference (raw, unfolded f32 params) for correctness checking
# ---------------------------------------------------------------------------
def _reference_forward(raw, x, latent_dim):
    B, T, P, C = x.shape
    h = x.reshape(B * T, P * C)
    h_prev = h
    for i, ((w, b), (scale, shift)) in enumerate(zip(raw["choir_enc"][:-1],
                                                     raw["choir_enc_bn"])):
        y = (h @ w + b) * scale + shift
        if i > 0:
            y = y - h_prev
        h = jax.nn.relu(y)
        h_prev = h
    we, be = raw["choir_enc"][-1]
    emb = (h @ we + be).reshape(B, T, -1)

    p = emb[:, :-1].reshape(B * (T - 1), -1)
    for (w, b), (scale, shift) in zip(raw["prior"][:-1], raw["prior_bn"]):
        p = jax.nn.relu((p @ w + b) * scale + shift)
    wl, bl = raw["prior"][-1]
    s = (p @ wl + bl).reshape(B, T - 1, -1)
    s_c = jnp.mean(s, axis=1)
    p_mu, p_lv = s_c[:, :latent_dim], s_c[:, latent_dim:]
    p_var = 0.1 + 0.9 * jax.nn.sigmoid(p_lv)
    z = p_mu

    dec_in = jnp.concatenate([z, emb[:, -1]], axis=-1)
    wz, bz = raw["z_linear"]
    zproj = z @ wz + bz
    d = dec_in
    for i, ((w, b), (scale, shift)) in enumerate(zip(raw["dec"][:-1], raw["dec_bn"])):
        y = (d @ w + b) * scale + shift
        if i > 0:
            y = y + zproj
        d = jax.nn.relu(y)
    wd, bd = raw["dec"][-1]
    dist = jax.nn.sigmoid(d @ wd + bd)
    choir = jnp.concatenate([x[:, -1, :, 0:1], dist.reshape(B, P, 1)], axis=-1)
    return choir, p_mu, p_var


if __name__ == "__main__":
    key = jax.random.PRNGKey(0)
    k_param, k_x = jax.random.split(key)

    B, T, P, C = 2, 8, 16, 2                 # batch, frames, bps_dim, choir_dim
    LATENT = 32
    raw = init_params(k_param, bps_dim=P, choir_dim=C, latent_dim=LATENT)
    w_slab, b_slab, meta = fold_and_pack(raw, bps_dim=P, latent_dim=LATENT,
                                         choir_in_dim=P * C)
    x = jax.random.normal(k_x, (B, T, P, C), jnp.float32)

    fwd = jax.jit(functools.partial(aggregate_ved_forward, meta))
    out = fwd(w_slab, b_slab, x)
    jax.block_until_ready(out["choir"])

    assert out["choir"].shape == (B, P, C)
    assert out["prior"][0].shape == (B, LATENT)
    assert out["prior"][1].shape == (B, LATENT)
    assert bool(jnp.all(jnp.isfinite(out["choir"])))
    assert bool(jnp.all(jnp.isfinite(out["prior"][0])))
    assert bool(jnp.all(jnp.isfinite(out["prior"][1])))

    # Verify against the pure-JAX f32 reference (validates BN folding, residual /
    # skip ordering, head lane placement, matmul-based frame aggregation and the
    # packed-output layout).  Tolerance loosened slightly for bf16 matmul inputs.
    ref_choir, ref_mu, ref_var = _reference_forward(raw, x, LATENT)
    assert bool(jnp.allclose(out["choir"], ref_choir, atol=5e-2, rtol=5e-2))
    assert bool(jnp.allclose(out["prior"][0], ref_mu, atol=5e-2, rtol=5e-2))
    assert bool(jnp.allclose(out["prior"][1], ref_var, atol=5e-2, rtol=5e-2))

    print("KERNEL_OK")
</pallas_src>

<mosaic_0001>
module attributes {stable_mosaic.version = 11 : i64} {
  func.func @_aggregate_ved_kernel(%arg0: memref<16x32xf32, #tpu.memory_space<vmem>>, %arg1: memref<4x16xf32, #tpu.memory_space<vmem>>, %arg2: memref<1312x128xbf16, #tpu.memory_space<vmem>>, %arg3: memref<10x128xf32, #tpu.memory_space<vmem>>, %arg4: memref<2x128xf32, #tpu.memory_space<vmem>>) attributes {dimension_semantics = [], scalar_prefetch = 0 : i64, scratch_operands = 0 : i64, tpu.core_type = #tpu.core_type<tc>} {
    %c0 = arith.constant 0 : index
    %c0_0 = arith.constant 0 : index
    %0 = vector.load %arg0[%c0, %c0_0] : memref<16x32xf32, #tpu.memory_space<vmem>>, vector<16x32xf32>
    %c0_1 = arith.constant 0 : index
    %c0_2 = arith.constant 0 : index
    %1 = vector.load %arg2[%c0_1, %c0_2] : memref<1312x128xbf16, #tpu.memory_space<vmem>>, vector<32x128xbf16>
    %2 = arith.truncf %0 : vector<16x32xf32> to vector<16x32xbf16>
    %cst = arith.constant dense<0.000000e+00> : vector<16x128xf32>
    %3 = tpu.matmul %2, %1, %cst {dimension_numbers = #tpu.dot_dimension_numbers<[1], [0], [0], [1], [0, 0, 1, 1], [], []>} : vector<16x32xbf16>, vector<32x128xbf16>, vector<16x128xf32> -> vector<16x128xf32>
    %c0_3 = arith.constant 0 : index
    %c0_4 = arith.constant 0 : index
    %4 = vector.load %arg3[%c0_3, %c0_4] : memref<10x128xf32, #tpu.memory_space<vmem>>, vector<1x128xf32>
    %5 = vector.broadcast %4 : vector<1x128xf32> to vector<16x128xf32>
    %6 = arith.addf %3, %5 : vector<16x128xf32>
    %cst_5 = arith.constant 0.000000e+00 : f32
    %7 = vector.broadcast %cst_5 : f32 to vector<16x128xf32>
    %8 = arith.maximumf %6, %7 : vector<16x128xf32>
    %c32 = arith.constant 32 : index
    %c0_6 = arith.constant 0 : index
    %9 = vector.load %arg2[%c32, %c0_6] : memref<1312x128xbf16, #tpu.memory_space<vmem>>, vector<128x128xbf16>
    %10 = arith.truncf %8 : vector<16x128xf32> to vector<16x128xbf16>
    %cst_7 = arith.constant dense<0.000000e+00> : vector<16x128xf32>
    %11 = tpu.matmul %10, %9, %cst_7 {dimension_numbers = #tpu.dot_dimension_numbers<[1], [0], [0], [1], [0, 0, 1, 1], [], []>} : vector<16x128xbf16>, vector<128x128xbf16>, vector<16x128xf32> -> vector<16x128xf32>
    %c1 = arith.constant 1 : index
    %c0_8 = arith.constant 0 : index
    %12 = vector.load %arg3[%c1, %c0_8] : memref<10x128xf32, #tpu.memory_space<vmem>>, vector<1x128xf32>
    %13 = vector.broadcast %12 : vector<1x128xf32> to vector<16x128xf32>
    %14 = arith.addf %11, %13 : vector<16x128xf32>
    %15 = arith.subf %14, %8 : vector<16x128xf32>
    %cst_9 = arith.constant 0.000000e+00 : f32
    %16 = vector.broadcast %cst_9 : f32 to vector<16x128xf32>
    %17 = arith.maximumf %15, %16 : vector<16x128xf32>
    %c160 = arith.constant 160 : index
    %c0_10 = arith.constant 0 : index
    %18 = vector.load %arg2[%c160, %c0_10] : memref<1312x128xbf16, #tpu.memory_space<vmem>>, vector<128x128xbf16>
    %19 = arith.truncf %17 : vector<16x128xf32> to vector<16x128xbf16>
    %cst_11 = arith.constant dense<0.000000e+00> : vector<16x128xf32>
    %20 = tpu.matmul %19, %18, %cst_11 {dimension_numbers = #tpu.dot_dimension_numbers<[1], [0], [0], [1], [0, 0, 1, 1], [], []>} : vector<16x128xbf16>, vector<128x128xbf16>, vector<16x128xf32> -> vector<16x128xf32>
    %c2 = arith.constant 2 : index
    %c0_12 = arith.constant 0 : index
    %21 = vector.load %arg3[%c2, %c0_12] : memref<10x128xf32, #tpu.memory_space<vmem>>, vector<1x128xf32>
    %22 = vector.broadcast %21 : vector<1x128xf32> to vector<16x128xf32>
    %23 = arith.addf %20, %22 : vector<16x128xf32>
    %c288 = arith.constant 288 : index
    %c0_13 = arith.constant 0 : index
    %24 = vector.load %arg2[%c288, %c0_13] : memref<1312x128xbf16, #tpu.memory_space<vmem>>, vector<128x128xbf16>
    %25 = arith.truncf %23 : vector<16x128xf32> to vector<16x128xbf16>
    %cst_14 = arith.constant dense<0.000000e+00> : vector<16x128xf32>
    %26 = tpu.matmul %25, %24, %cst_14 {dimension_numbers = #tpu.dot_dimension_numbers<[1], [0], [0], [1], [0, 0, 1, 1], [], []>} : vector<16x128xbf16>, vector<128x128xbf16>, vector<16x128xf32> -> vector<16x128xf32>
    %c3 = arith.constant 3 : index
    %c0_15 = arith.constant 0 : index
    %27 = vector.load %arg3[%c3, %c0_15] : memref<10x128xf32, #tpu.memory_space<vmem>>, vector<1x128xf32>
    %28 = vector.broadcast %27 : vector<1x128xf32> to vector<16x128xf32>
    %29 = arith.addf %26, %28 : vector<16x128xf32>
    %cst_16 = arith.constant 0.000000e+00 : f32
    %30 = vector.broadcast %cst_16 : f32 to vector<16x128xf32>
    %31 = arith.maximumf %29, %30 : vector<16x128xf32>
    %c416 = arith.constant 416 : index
    %c0_17 = arith.constant 0 : index
    %32 = vector.load %arg2[%c416, %c0_17] : memref<1312x128xbf16, #tpu.memory_space<vmem>>, vector<128x128xbf16>
    %33 = arith.truncf %31 : vector<16x128xf32> to vector<16x128xbf16>
    %cst_18 = arith.constant dense<0.000000e+00> : vector<16x128xf32>
    %34 = tpu.matmul %33, %32, %cst_18 {dimension_numbers = #tpu.dot_dimension_numbers<[1], [0], [0], [1], [0, 0, 1, 1], [], []>} : vector<16x128xbf16>, vector<128x128xbf16>, vector<16x128xf32> -> vector<16x128xf32>
    %c4 = arith.constant 4 : index
    %c0_19 = arith.constant 0 : index
    %35 = vector.load %arg3[%c4, %c0_19] : memref<10x128xf32, #tpu.memory_space<vmem>>, vector<1x128xf32>
    %36 = vector.broadcast %35 : vector<1x128xf32> to vector<16x128xf32>
    %37 = arith.addf %34, %36 : vector<16x128xf32>
    %cst_20 = arith.constant 0.000000e+00 : f32
    %38 = vector.broadcast %cst_20 : f32 to vector<16x128xf32>
    %39 = arith.maximumf %37, %38 : vector<16x128xf32>
    %c544 = arith.constant 544 : index
    %c0_21 = arith.constant 0 : index
    %40 = vector.load %arg2[%c544, %c0_21] : memref<1312x128xbf16, #tpu.memory_space<vmem>>, vector<128x128xbf16>
    %41 = arith.truncf %39 : vector<16x128xf32> to vector<16x128xbf16>
    %cst_22 = arith.constant dense<0.000000e+00> : vector<16x128xf32>
    %42 = tpu.matmul %41, %40, %cst_22 {dimension_numbers = #tpu.dot_dimension_numbers<[1], [0], [0], [1], [0, 0, 1, 1], [], []>} : vector<16x128xbf16>, vector<128x128xbf16>, vector<16x128xf32> -> vector<16x128xf32>
    %c5 = arith.constant 5 : index
    %c0_23 = arith.constant 0 : index
    %43 = vector.load %arg3[%c5, %c0_23] : memref<10x128xf32, #tpu.memory_space<vmem>>, vector<1x128xf32>
    %44 = vector.broadcast %43 : vector<1x128xf32> to vector<16x128xf32>
    %45 = arith.addf %42, %44 : vector<16x128xf32>
    %c0_24 = arith.constant 0 : index
    %c0_25 = arith.constant 0 : index
    %46 = vector.load %arg1[%c0_24, %c0_25] : memref<4x16xf32, #tpu.memory_space<vmem>>, vector<4x16xf32>
    %47 = vector.extract_strided_slice %46 {offsets = [0, 0], sizes = [2, 16], strides = [1, 1]} : vector<4x16xf32> to vector<2x16xf32>
    %cst_26 = arith.constant dense<0.000000e+00> : vector<2x128xf32>
    %48 = tpu.matmul %47, %45, %cst_26 {dimension_numbers = #tpu.dot_dimension_numbers<[1], [0], [0], [1], [0, 0, 1, 1], [], []>} : vector<2x16xf32>, vector<16x128xf32>, vector<2x128xf32> -> vector<2x128xf32>
    %49 = vector.extract_strided_slice %46 {offsets = [2, 0], sizes = [2, 16], strides = [1, 1]} : vector<4x16xf32> to vector<2x16xf32>
    %cst_27 = arith.constant dense<0.000000e+00> : vector<2x128xf32>
    %50 = tpu.matmul %49, %23, %cst_27 {dimension_numbers = #tpu.dot_dimension_numbers<[1], [0], [0], [1], [0, 0, 1, 1], [], []>} : vector<2x16xf32>, vector<16x128xf32>, vector<2x128xf32> -> vector<2x128xf32>
    %c672 = arith.constant 672 : index
    %c0_28 = arith.constant 0 : index
    %51 = vector.load %arg2[%c672, %c0_28] : memref<1312x128xbf16, #tpu.memory_space<vmem>>, vector<128x128xbf16>
    %52 = arith.truncf %48 : vector<2x128xf32> to vector<2x128xbf16>
    %cst_29 = arith.constant dense<0.000000e+00> : vector<2x128xf32>
    %53 = tpu.matmul %52, %51, %cst_29 {dimension_numbers = #tpu.dot_dimension_numbers<[1], [0], [0], [1], [0, 0, 1, 1], [], []>} : vector<2x128xbf16>, vector<128x128xbf16>, vector<2x128xf32> -> vector<2x128xf32>
    %c6 = arith.constant 6 : index
    %c0_30 = arith.constant 0 : index
    %54 = vector.load %arg3[%c6, %c0_30] : memref<10x128xf32, #tpu.memory_space<vmem>>, vector<1x128xf32>
    %55 = vector.broadcast %54 : vector<1x128xf32> to vector<2x128xf32>
    %56 = arith.addf %53, %55 : vector<2x128xf32>
    %c800 = arith.constant 800 : index
    %c0_31 = arith.constant 0 : index
    %57 = vector.load %arg2[%c800, %c0_31] : memref<1312x128xbf16, #tpu.memory_space<vmem>>, vector<128x128xbf16>
    %58 = arith.truncf %48 : vector<2x128xf32> to vector<2x128xbf16>
    %cst_32 = arith.constant dense<0.000000e+00> : vector<2x128xf32>
    %59 = tpu.matmul %58, %57, %cst_32 {dimension_numbers = #tpu.dot_dimension_numbers<[1], [0], [0], [1], [0, 0, 1, 1], [], []>} : vector<2x128xbf16>, vector<128x128xbf16>, vector<2x128xf32> -> vector<2x128xf32>
    %c928 = arith.constant 928 : index
    %c0_33 = arith.constant 0 : index
    %60 = vector.load %arg2[%c928, %c0_33] : memref<1312x128xbf16, #tpu.memory_space<vmem>>, vector<128x128xbf16>
    %61 = arith.truncf %50 : vector<2x128xf32> to vector<2x128xbf16>
    %cst_34 = arith.constant dense<0.000000e+00> : vector<2x128xf32>
    %62 = tpu.matmul %61, %60, %cst_34 {dimension_numbers = #tpu.dot_dimension_numbers<[1], [0], [0], [1], [0, 0, 1, 1], [], []>} : vector<2x128xbf16>, vector<128x128xbf16>, vector<2x128xf32> -> vector<2x128xf32>
    %63 = arith.addf %59, %62 : vector<2x128xf32>
    %c7 = arith.constant 7 : index
    %c0_35 = arith.constant 0 : index
    %64 = vector.load %arg3[%c7, %c0_35] : memref<10x128xf32, #tpu.memory_space<vmem>>, vector<1x128xf32>
    %65 = vector.broadcast %64 : vector<1x128xf32> to vector<2x128xf32>
    %66 = arith.addf %63, %65 : vector<2x128xf32>
    %cst_36 = arith.constant 0.000000e+00 : f32
    %67 = vector.broadcast %cst_36 : f32 to vector<2x128xf32>
    %68 = arith.maximumf %66, %67 : vector<2x128xf32>
    %c1056 = arith.constant 1056 : index
    %c0_37 = arith.constant 0 : index
    %69 = vector.load %arg2[%c1056, %c0_37] : memref<1312x128xbf16, #tpu.memory_space<vmem>>, vector<128x128xbf16>
    %70 = arith.truncf %68 : vector<2x128xf32> to vector<2x128xbf16>
    %cst_38 = arith.constant dense<0.000000e+00> : vector<2x128xf32>
    %71 = tpu.matmul %70, %69, %cst_38 {dimension_numbers = #tpu.dot_dimension_numbers<[1], [0], [0], [1], [0, 0, 1, 1], [], []>} : vector<2x128xbf16>, vector<128x128xbf16>, vector<2x128xf32> -> vector<2x128xf32>
    %c8 = arith.constant 8 : index
    %c0_39 = arith.constant 0 : index
    %72 = vector.load %arg3[%c8, %c0_39] : memref<10x128xf32, #tpu.memory_space<vmem>>, vector<1x128xf32>
    %73 = vector.broadcast %72 : vector<1x128xf32> to vector<2x128xf32>
    %74 = arith.addf %71, %73 : vector<2x128xf32>
    %75 = arith.addf %74, %56 : vector<2x128xf32>
    %cst_40 = arith.constant 0.000000e+00 : f32
    %76 = vector.broadcast %cst_40 : f32 to vector<2x128xf32>
    %77 = arith.maximumf %75, %76 : vector<2x128xf32>
    %c1184 = arith.constant 1184 : index
    %c0_41 = arith.constant 0 : index
    %78 = vector.load %arg2[%c1184, %c0_41] : memref<1312x128xbf16, #tpu.memory_space<vmem>>, vector<128x128xbf16>
    %79 = arith.truncf %77 : vector<2x128xf32> to vector<2x128xbf16>
    %cst_42 = arith.constant dense<0.000000e+00> : vector<2x128xf32>
    %80 = tpu.matmul %79, %78, %cst_42 {dimension_numbers = #tpu.dot_dimension_numbers<[1], [0], [0], [1], [0, 0, 1, 1], [], []>} : vector<2x128xbf16>, vector<128x128xbf16>, vector<2x128xf32> -> vector<2x128xf32>
    %c9 = arith.constant 9 : index
    %c0_43 = arith.constant 0 : index
    %81 = vector.load %arg3[%c9, %c0_43] : memref<10x128xf32, #tpu.memory_space<vmem>>, vector<1x128xf32>
    %82 = vector.broadcast %81 : vector<1x128xf32> to vector<2x128xf32>
    %83 = arith.addf %80, %82 : vector<2x128xf32>
    %84 = tpu.iota {dimensions = array<i32: 1>} : vector<2x128xi32>
    %85 = arith.negf %48 : vector<2x128xf32>
    %86 = math.exp %85 : vector<2x128xf32>
    %cst_44 = arith.constant 1.000000e+00 : f32
    %87 = vector.broadcast %cst_44 : f32 to vector<2x128xf32>
    %88 = arith.addf %87, %86 : vector<2x128xf32>
    %89 = arith.divf %87, %88 : vector<2x128xf32>
    %cst_45 = arith.constant 0.899999976 : f32
    %90 = vector.broadcast %cst_45 : f32 to vector<2x128xf32>
    %91 = arith.mulf %90, %89 : vector<2x128xf32>
    %cst_46 = arith.constant 1.000000e-01 : f32
    %92 = vector.broadcast %cst_46 : f32 to vector<2x128xf32>
    %93 = arith.addf %92, %91 : vector<2x128xf32>
    %c16_i32 = arith.constant 16 : i32
    %94 = vector.broadcast %c16_i32 : i32 to vector<2x128xi32>
    %95 = arith.cmpi slt, %84, %94 : vector<2x128xi32>
    %96 = arith.negf %83 : vector<2x128xf32>
    %97 = math.exp %96 : vector<2x128xf32>
    %cst_47 = arith.constant 1.000000e+00 : f32
    %98 = vector.broadcast %cst_47 : f32 to vector<2x128xf32>
    %99 = arith.addf %98, %97 : vector<2x128xf32>
    %100 = arith.divf %98, %99 : vector<2x128xf32>
    %c48_i32 = arith.constant 48 : i32
    %101 = vector.broadcast %c48_i32 : i32 to vector<2x128xi32>
    %102 = arith.cmpi slt, %84, %101 : vector<2x128xi32>
    %c80_i32 = arith.constant 80 : i32
    %103 = vector.broadcast %c80_i32 : i32 to vector<2x128xi32>
    %104 = arith.cmpi slt, %84, %103 : vector<2x128xi32>
    %cst_48 = arith.constant 0.000000e+00 : f32
    %105 = vector.broadcast %cst_48 : f32 to vector<2x128xf32>
    %106 = arith.select %104, %93, %105 : vector<2x128xi1>, vector<2x128xf32>
    %107 = arith.select %102, %48, %106 : vector<2x128xi1>, vector<2x128xf32>
    %108 = arith.select %95, %100, %107 : vector<2x128xi1>, vector<2x128xf32>
    %c0_49 = arith.constant 0 : index
    %c0_50 = arith.constant 0 : index
    %109 = vector.load %arg4[%c0_49, %c0_50] : memref<2x128xf32, #tpu.memory_space<vmem>>, vector<2x128xf32>
    tpu.vector_store %arg4[%c0_49, %c0_50], %108 {strides = array<i32>} : memref<2x128xf32, #tpu.memory_space<vmem>>, vector<2x128xf32>,
    return
  }
}

</mosaic_0001>

<bundles_post_ra>
// kernel: aggregate_ved_forward.1
= control target key start
LH: loop header
LB: loop body
LE: loop exit
PB: predicated region body
PF: predicated region fallthrough
CT: control target
= control target key end

     0   :  { %9 = vsyncpa [#allocation3], 0  ;;  %s1940_s15 = smov [#allocation2]   ;;  %s2143_s0 = inlined_call_operand.vmem [shape: f32[16,32], index: 0, kind: input, shape index: {}]   ;;  %s2144_s1 = inlined_call_operand.vmem [shape: f32[4,16], index: 1, kind: input, shape index: {}]   ;;  %s2145_s2 = inlined_call_operand.hbm [shape: bf16[1312,128], index: 2, kind: input, shape index: {}]   ;;  %s2146_s3 = inlined_call_operand.vmem [shape: f32[10,128], index: 3, kind: input, shape index: {}]   ;;  %s2147_s4 = inlined_call_operand.vmem [shape: f32[2,128], index: 4, kind: output, shape index: {}]  }
   0x1   :  { %s19_s16 = sshll.u32 %s1940_s15, 4  ;;  %s1916_s19 = scalar_lea.hbm %s2145_s2, 10496  ;;  %s20_s16 = int_to_ptr.vmem [resolvable:$true] %s19_s16 }
   0x2   :  { %p1917_p0 = scmp.ne.s32.totalorder %s2145_s2, %s1916_s19  ;;  %p1920_p1 = scmp.lt.u32.totalorder %s1916_s19, %s2145_s2 }
   0x4   :  { %p1922_p2 = pnand %p1920_p1, %p1917_p0 }
   0x6   :  { %1925 = shalt.err (!%p1922_p2)
}
   0x7   :  { %s1926_s24 = scalar_lea.vmem %s20_s16, 10496  ;;  %p1931_p4 = scmp.lt.s32.totalorder %s20_s16, %s20_s16 }
   0x8   :  { %p1927_p3 = scmp.ne.s32.totalorder %s20_s16, %s1926_s24  ;;  %p1932_p5 = scmp.lt.s32.totalorder %s1926_s24, %s1926_s24 }
   0xa   :  { %p1933_p6 = por %p1932_p5, %p1931_p4 }
   0xc   :  { %p1934_p7 = pnand %p1933_p6, %p1927_p3 }
   0xe   :  { %1937 = shalt.err (!%p1934_p7)
}
   0xf   :  { %s1941_s25 = smov 64   ;;  %s1942_s26 = smov 4  }
  0x10   :  { %25 = dma.hbm_to_vmem [thread:$0]  %s2145_s2, 10496, %s20_s16, [#allocation3], %s1941_s25, %s1941_s25, %s1942_s26  }
  0x11   :  { %1938 = dma.done.wait [#allocation3], 10496  }
  0x12   :  { %1939 = vsyncadd [#allocation3], 4294956800  ;;  %v1943_v0 = vmov 0.0   ;;  %vm1944_vm0 = vmmov 0   ;;  %v1826_v1 = vld [vmem:[#allocation2] sm:$0xff]   ;;  %v1827_v2 = vld [vmem:[#allocation2 + $0x8] sm:$0xff]  }
  0x13   :  { %1586 = vmatprep.subr.bf16.mxu1 %v1943_v0  ;;  %1590 = vmatprep.mubr.msk.bf16.mxu1 %vm1944_vm0, %v1943_v0  ;;  %v32_v3 = vld [vmem:[%s2143_s0] sm:$0xff]  ;;  %v33_v4 = vld [vmem:[%s2143_s0 + $0x8] sm:$0xff]  ;;  %vm56_vm1 = vcmask 261120   ;;  %v1828_v6 = vld [vmem:[#allocation2 + $0x10] sm:$0xff]   ;;  %vm667_vm2 = vcmask 130048  }
  0x14   :  { %1614 = vmatprep.subr.bf16.mxu0 %v1943_v0  ;;  %1630 = vmatprep.mubr.msk.bf16.mxu0 %vm1944_vm0, %v1943_v0  ;;  %v38_v5 = vpack.c.bf16 %v33_v4, %v32_v3  ;;  %v1829_v7 = vld [vmem:[#allocation2 + $0x18] sm:$0xff]   ;;  %v1830_v8 = vld [vmem:[#allocation2 + $0x20] sm:$0xff]   ;;  %v1831_v9 = vld [vmem:[#allocation2 + $0x28] sm:$0xff]  }
  0x15   :  { %1587 = vmatpush3.bf16.msra.mxu1 %v1826_v1  ;;  %v1832_v10 = vld [vmem:[#allocation2 + $0x30] sm:$0xff]   ;;  %v1833_v11 = vld [vmem:[#allocation2 + $0x38] sm:$0xff]   ;;  %v1834_v12 = vld [vmem:[#allocation2 + $0x40] sm:$0xff]  }
  0x16   :  { %1588 = vmatprep.subr.bf16.mxu1 %v1943_v0  ;;  %v1835_v13 = vld [vmem:[#allocation2 + $0x48] sm:$0xff]   ;;  %v1836_v14 = vld [vmem:[#allocation2 + $0x50] sm:$0xff]   ;;  %v1837_v15 = vld [vmem:[#allocation2 + $0x58] sm:$0xff]  }
  0x17   :  { %1615 = vmatpush3.bf16.msra.mxu0 %v1836_v14  ;;  %v1838_v16 = vld [vmem:[#allocation2 + $0x60] sm:$0xff]   ;;  %v1839_v17 = vld [vmem:[#allocation2 + $0x68] sm:$0xff]   ;;  %v1840_v18 = vld [vmem:[#allocation2 + $0x70] sm:$0xff]  }
  0x18   :  { %1616 = vmatprep.subr.bf16.mxu0 %v1943_v0  ;;  %v1390_v19 = vld [vmem:[%s2146_s3] ss:$0 sm:$0xff]  ;;  %v1841_v29 = vld [vmem:[#allocation2 + $0x78] sm:$0xff]   ;;  %v1843_v31 = vld [vmem:[#allocation2 + $0x88] sm:$0xff]  }
  0x19   :  { %1589 = vmatpush3.bf16.msra.mxu1 %v1827_v2  ;;  %v1842_v30 = vld [vmem:[#allocation2 + $0x80] sm:$0xff]   ;;  %v1844_v32 = vld [vmem:[#allocation2 + $0x90] sm:$0xff]   ;;  %v1845_v33 = vld [vmem:[#allocation2 + $0x98] sm:$0xff]  }
  0x1a   :  { %1594 = vmatprep.subr.bf16.mxu1 %v1943_v0  ;;  %v1846_v34 = vld [vmem:[#allocation2 + $0xa0] sm:$0xff]   ;;  %v1847_v35 = vld [vmem:[#allocation2 + $0xa8] sm:$0xff]   ;;  %v1848_v36 = vld [vmem:[#allocation2 + $0xb0] sm:$0xff]  }
  0x1b   :  { %1617 = vmatpush3.bf16.msra.mxu0 %v1837_v15  ;;  %v1849_v37 = vld [vmem:[#allocation2 + $0xb8] sm:$0xff]   ;;  %v1394_v38 = vld [vmem:[%s2146_s3 + $0x1] ss:$0 sm:$0xff]  ;;  %v1851_v51 = vld [vmem:[#allocation2 + $0xc8] sm:$0xff]  }
  0x1c   :  { %1591 = vmatmul.mubr.msk.bf16.vlgmr.msra.gmra.mrb[0].mxu1 %vm56_vm1, %v38_v5  ;;  %1618 = vmatprep.subr.bf16.mxu0 %v1943_v0  ;;  %v1850_v50 = vld [vmem:[#allocation2 + $0xc0] sm:$0xff]   ;;  %v1852_v52 = vld [vmem:[#allocation2 + $0xd0] sm:$0xff]   ;;  %v1853_v53 = vld [vmem:[#allocation2 + $0xd8] sm:$0xff]  }
  0x1d   :  { %1595 = vmatpush3.bf16.msra.mxu1 %v1828_v6  ;;  %1610 = vmatprep.mubr.msk.bf16.mxu1 %vm1944_vm0, %v1943_v0  ;;  %v1854_v54 = vld [vmem:[#allocation2 + $0xe0] sm:$0xff]   ;;  %v1855_v55 = vld [vmem:[#allocation2 + $0xe8] sm:$0xff]   ;;  %v1856_v56 = vld [vmem:[#allocation2 + $0xf0] sm:$0xff]  }
  0x1e   :  { %1596 = vmatprep.subr.bf16.mxu1 %v1943_v0  ;;  %v1857_v57 = vld [vmem:[#allocation2 + $0xf8] sm:$0xff]   ;;  %v1403_v58 = vld [vmem:[%s2146_s3 + $0x2] ss:$0 sm:$0xff]  ;;  %v1859_v4 = vld [vmem:[#allocation2 + $0x108] sm:$0xff]  }
  0x1f   :  { %1619 = vmatpush3.bf16.msra.mxu0 %v1838_v16  ;;  %v1858_v3 = vld [vmem:[#allocation2 + $0x100] sm:$0xff]   ;;  %v1860_v5 = vld [vmem:[#allocation2 + $0x110] sm:$0xff]   ;;  %v1861_v6 = vld [vmem:[#allocation2 + $0x118] sm:$0xff]  }
  0x20   :  { %1620 = vmatprep.subr.bf16.mxu0 %v1943_v0 }
  0x21   :  { %1597 = vmatpush3.bf16.msra.mxu1 %v1829_v7  ;;  %v1862_v7 = vld [vmem:[#allocation2 + $0x120] sm:$0xff]  }
  0x22   :  { %1598 = vmatprep.subr.bf16.mxu1 %v1943_v0 }
  0x23   :  { %1621 = vmatpush3.bf16.msra.mxu0 %v1839_v17 }
  0x24   :  { %1622 = vmatprep.subr.bf16.mxu0 %v1943_v0 }
  0x25   :  { %1599 = vmatpush3.bf16.msra.mxu1 %v1830_v8  ;;  %v1863_v8 = vld [vmem:[#allocation2 + $0x128] sm:$0xff]  }
  0x26   :  { %1600 = vmatprep.subr.bf16.mxu1 %v1943_v0 }
  0x27   :  { %1623 = vmatpush3.bf16.msra.mxu0 %v1840_v18 }
  0x28   :  { %1624 = vmatprep.subr.bf16.mxu0 %v1943_v0 }
  0x29   :  { %1601 = vmatpush3.bf16.msra.mxu1 %v1831_v9  ;;  %v1864_v9 = vld [vmem:[#allocation2 + $0x130] sm:$0xff]  }
  0x2a   :  { %1602 = vmatprep.subr.bf16.mxu1 %v1943_v0 }
  0x2b   :  { %1625 = vmatpush3.bf16.msra.mxu0 %v1841_v29 }
  0x2c   :  { %1626 = vmatprep.subr.bf16.mxu0 %v1943_v0 }
  0x2d   :  { %1603 = vmatpush3.bf16.msra.mxu1 %v1832_v10  ;;  %v1865_v10 = vld [vmem:[#allocation2 + $0x138] sm:$0xff]  }
  0x2e   :  { %1604 = vmatprep.subr.bf16.mxu1 %v1943_v0 }
  0x2f   :  { %1627 = vmatpush3.bf16.msra.mxu0 %v1842_v30 }
  0x30   :  { %1628 = vmatprep.subr.bf16.mxu0 %v1943_v0 }
  0x31   :  { %1605 = vmatpush3.bf16.msra.mxu1 %v1833_v11  ;;  %v1412_v11 = vld [vmem:[%s2146_s3 + $0x3] ss:$0 sm:$0xff] }
  0x32   :  { %1606 = vmatprep.subr.bf16.mxu1 %v1943_v0 }
  0x33   :  { %1629 = vmatpush3.bf16.msra.mxu0 %v1843_v31 }
  0x34   :  { %1654 = vmatprep.subr.bf16.mxu0 %v1943_v0 }
  0x35   :  { %1607 = vmatpush3.bf16.msra.mxu1 %v1834_v12 }
  0x36   :  { %1608 = vmatprep.subr.bf16.mxu1 %v1943_v0 }
  0x39   :  { %1609 = vmatpush3.bf16.msra.mxu1 %v1835_v13 }
  0x3a   :  { %1634 = vmatprep.subr.bf16.mxu1 %v1943_v0 }
  0xef   :  { %v94_v20 = vpop.f32.mrb[0].mxu1 }
  0xf0   :  { %v95_v21 = vadd.f32 %v1390_v19, %v94_v20  ;;  %v1592_v22 = vpop.f32.mrb[1].mxu1 }
  0xf1   :  { %v97_v23 = vpop.f32.mrb[2].mxu1  ;;  %v1867_v22 = vld [vmem:[#allocation2 + $0x148] sm:$0xff]  }
  0xf2   :  { %v98_v24 = vadd.f32 %v1390_v19, %v97_v23  ;;  %v1593_v25 = vpop.f32.mrb[3].mxu1  ;;  %v101_v26 = vmax.f32 %v95_v21, 0.0  ;;  %v1866_v21 = vld [vmem:[#allocation2 + $0x140] sm:$0xff]  }
  0xf3   :  { %v1421_v23 = vld [vmem:[%s2146_s3 + $0x4] ss:$0 sm:$0xff] }
  0xf4   :  { %v102_v27 = vmax.f32 %v98_v24, 0.0 }
  0xf6   :  { %v119_v28 = vpack.c.bf16 %v102_v27, %v101_v26 }
  0xf8   :  { %1611 = vmatmul.mubr.bf16.vlgmr.msra.gmra.mrb[4].mxu1 %v119_v28 }
  0xf9   :  { %1650 = vmatprep.mubr.msk.bf16.mxu1 %vm1944_vm0, %v1943_v0  ;;  %1635 = vmatpush3.bf16.msra.mxu1 %v1844_v32 }
  0xfa   :  { %1636 = vmatprep.subr.bf16.mxu1 %v1943_v0 }
  0xfd   :  { %1637 = vmatpush3.bf16.msra.mxu1 %v1845_v33  ;;  %v1945_v33 = vmov 0.0|0.0  }
  0xfe   :  { %1638 = vmatprep.subr.bf16.mxu1 %v1943_v0 }
 0x101   :  { %1639 = vmatpush3.bf16.msra.mxu1 %v1846_v34  ;;  %v1430_v34 = vld [vmem:[%s2146_s3 + $0x5] ss:$0 sm:$0xff] }
 0x102   :  { %1640 = vmatprep.subr.bf16.mxu1 %v1943_v0 }
 0x105   :  { %1641 = vmatpush3.bf16.msra.mxu1 %v1847_v35 }
 0x106   :  { %1642 = vmatprep.subr.bf16.mxu1 %v1943_v0 }
 0x109   :  { %1643 = vmatpush3.bf16.msra.mxu1 %v1848_v36 }
 0x10a   :  { %1644 = vmatprep.subr.bf16.mxu1 %v1943_v0 }
 0x10d   :  { %1645 = vmatpush3.bf16.msra.mxu1 %v1849_v37 }
 0x10e   :  { %1646 = vmatprep.subr.bf16.mxu1 %v1943_v0 }
 0x111   :  { %1647 = vmatpush3.bf16.msra.mxu1 %v1850_v50  ;;  %v1874_v50 = vld [vmem:[#allocation2 + $0x180] sm:$0xff]  }
 0x112   :  { %1648 = vmatprep.subr.bf16.mxu1 %v1943_v0 }
 0x115   :  { %1649 = vmatpush3.bf16.msra.mxu1 %v1851_v51  ;;  %v1875_v51 = vld [vmem:[#allocation2 + $0x188] sm:$0xff]  }
 0x116   :  { %1674 = vmatprep.subr.bf16.mxu1 %v1943_v0 }
 0x1cb   :  { %v207_v39 = vpop.f32.mrb[4].mxu1 }
 0x1cc   :  { %v208_v40 = vadd.f32 %v1394_v38, %v207_v39  ;;  %v1612_v41 = vpop.f32.mrb[5].mxu1 }
 0x1cd   :  { %v210_v42 = vpop.f32.mrb[6].mxu1 }
 0x1ce   :  { %v214_v43 = vsub.f32 %v208_v40, %v101_v26  ;;  %v211_v44 = vadd.f32 %v1394_v38, %v210_v42  ;;  %v1613_v45 = vpop.f32.mrb[7].mxu1  ;;  %v666_v42 = vld [vmem:[%s2144_s1] sm:$0xf] }
 0x1cf   :  { %v1869_v45 = vld [vmem:[#allocation2 + $0x158] sm:$0xff]  }
 0x1d0   :  { %v215_v46 = vsub.f32 %v211_v44, %v102_v27  ;;  %v216_v47 = vmax.f32 %v214_v43, 0.0  ;;  %v741_v43 = vrot.slane %v666_v42, 2  ;;  %v1868_v44 = vld [vmem:[#allocation2 + $0x150] sm:$0xff]  }
 0x1d2   :  { %v217_v48 = vmax.f32 %v215_v46, 0.0  ;;  %v1870_v46 = vld [vmem:[#allocation2 + $0x160] sm:$0xff]  }
 0x1d4   :  { %v234_v49 = vpack.c.bf16 %v217_v48, %v216_v47  ;;  %v1871_v47 = vld [vmem:[#allocation2 + $0x168] sm:$0xff]   ;;  %v1872_v48 = vld [vmem:[#allocation2 + $0x170] sm:$0xff]  }
 0x1d6   :  { %1631 = vmatmul.mubr.bf16.vlgmr.msra.gmra.mrb[0].mxu0 %v234_v49  ;;  %v1873_v49 = vld [vmem:[#allocation2 + $0x178] sm:$0xff]  }
 0x1d7   :  { %1670 = vmatprep.mubr.msk.bf16.mxu0 %vm1944_vm0, %v1943_v0  ;;  %1655 = vmatpush3.bf16.msra.mxu0 %v1852_v52  ;;  %v1876_v52 = vld [vmem:[#allocation2 + $0x1d0] sm:$0xff]  }
 0x1d8   :  { %1656 = vmatprep.subr.bf16.mxu0 %v1943_v0 }
 0x1db   :  { %1657 = vmatpush3.bf16.msra.mxu0 %v1853_v53  ;;  %v1878_v53 = vld [vmem:[#allocation2 + $0x1d8] sm:$0xff]  }
 0x1dc   :  { %1658 = vmatprep.subr.bf16.mxu0 %v1943_v0 }
 0x1df   :  { %1659 = vmatpush3.bf16.msra.mxu0 %v1854_v54  ;;  %v1880_v54 = vld [vmem:[#allocation2 + $0x1e0] sm:$0xff]  }
 0x1e0   :  { %1660 = vmatprep.subr.bf16.mxu0 %v1943_v0 }
 0x1e3   :  { %1661 = vmatpush3.bf16.msra.mxu0 %v1855_v55  ;;  %v1882_v55 = vld [vmem:[#allocation2 + $0x1e8] sm:$0xff]  }
 0x1e4   :  { %1662 = vmatprep.subr.bf16.mxu0 %v1943_v0 }
 0x1e7   :  { %1663 = vmatpush3.bf16.msra.mxu0 %v1856_v56  ;;  %v1884_v56 = vld [vmem:[#allocation2 + $0x1f0] sm:$0xff]  }
 0x1e8   :  { %1664 = vmatprep.subr.bf16.mxu0 %v1943_v0 }
 0x1eb   :  { %1665 = vmatpush3.bf16.msra.mxu0 %v1857_v57  ;;  %v1886_v57 = vld [vmem:[#allocation2 + $0x1f8] sm:$0xff]  }
 0x1ec   :  { %1666 = vmatprep.subr.bf16.mxu0 %v1943_v0 }
 0x1ef   :  { %1667 = vmatpush3.bf16.msra.mxu0 %v1858_v3 }
 0x1f0   :  { %1668 = vmatprep.subr.bf16.mxu0 %v1943_v0 }
 0x1f3   :  { %1669 = vmatpush3.bf16.msra.mxu0 %v1859_v4 }
 0x1f4   :  { %1808 = vmatprep.subr.bf16.mxu0 %v1945_v33 }
 0x2a9   :  { %v322_v59 = vpop.f32.mrb[0].mxu0 }
 0x2aa   :  { %v1632_v60 = vpop.f32.mrb[1].mxu0  ;;  %v323_v62 = vadd.f32 %v1403_v58, %v322_v59  ;;  %v1890_v59 = vld [vmem:[#allocation2 + $0x208] sm:$0xff]  }
 0x2ab   :  { %v325_v61 = vpop.f32.mrb[2].mxu0 }
 0x2ac   :  { %v326_v63 = vadd.f32 %v1403_v58, %v325_v61  ;;  %v1633_v1 = vpop.f32.mrb[3].mxu0  ;;  %v1888_v58 = vld [vmem:[#allocation2 + $0x200] sm:$0xff]   ;;  %v1877_v61 = vld [vmem:[#allocation2 + $0x190] sm:$0xff]  }
 0x2ad   :  { %v1879_v1 = vld [vmem:[#allocation2 + $0x198] sm:$0xff]  }
 0x2ae   :  { %v2042_v2 = vpack.c.bf16 %v326_v63, %v323_v62 }
 0x2b0   :  { %1651 = vmatmul.mubr.bf16.vlgmr.msra.gmra.mrb[8].mxu1 %v2042_v2 }
 0x2b1   :  { %1690 = vmatprep.mubr.msk.bf16.mxu1 %vm1944_vm0, %v1943_v0  ;;  %1675 = vmatpush3.bf16.msra.mxu1 %v1860_v5  ;;  %v1881_v5 = vld [vmem:[#allocation2 + $0x1a0] sm:$0xff]  }
 0x2b2   :  { %1676 = vmatprep.subr.bf16.mxu1 %v1943_v0 }
 0x2b5   :  { %1677 = vmatpush3.bf16.msra.mxu1 %v1861_v6  ;;  %v1883_v6 = vld [vmem:[#allocation2 + $0x1a8] sm:$0xff]  }
 0x2b6   :  { %1678 = vmatprep.subr.bf16.mxu1 %v1943_v0 }
 0x2b9   :  { %1679 = vmatpush3.bf16.msra.mxu1 %v1862_v7  ;;  %v1885_v7 = vld [vmem:[#allocation2 + $0x1b0] sm:$0xff]  }
 0x2ba   :  { %1680 = vmatprep.subr.bf16.mxu1 %v1943_v0 }
 0x2bd   :  { %1681 = vmatpush3.bf16.msra.mxu1 %v1863_v8  ;;  %v1887_v8 = vld [vmem:[#allocation2 + $0x1b8] sm:$0xff]  }
 0x2be   :  { %1682 = vmatprep.subr.bf16.mxu1 %v1943_v0 }
 0x2c1   :  { %1683 = vmatpush3.bf16.msra.mxu1 %v1864_v9  ;;  %v1889_v9 = vld [vmem:[#allocation2 + $0x1c0] sm:$0xff]  }
 0x2c2   :  { %1684 = vmatprep.subr.bf16.mxu1 %v1943_v0 }
 0x2c5   :  { %1685 = vmatpush3.bf16.msra.mxu1 %v1865_v10  ;;  %v1891_v10 = vld [vmem:[#allocation2 + $0x1c8] sm:$0xff]  }
 0x2c6   :  { %1686 = vmatprep.subr.bf16.mxu1 %v1943_v0 }
 0x2c9   :  { %1687 = vmatpush3.bf16.msra.mxu1 %v1866_v21  ;;  %v1902_v21 = vld [vmem:[#allocation2 + $0x260] sm:$0xff]  }
 0x2ca   :  { %1688 = vmatprep.subr.bf16.mxu1 %v1943_v0 }
 0x2cd   :  { %1689 = vmatpush3.bf16.msra.mxu1 %v1867_v22  ;;  %v1903_v22 = vld [vmem:[#allocation2 + $0x268] sm:$0xff]  }
 0x2ce   :  { %1728 = vmatprep.subr.bf16.mxu1 %v1943_v0 }
 0x383   :  { %v433_v12 = vpop.f32.mrb[8].mxu1 }
 0x384   :  { %v434_v13 = vadd.f32 %v1412_v11, %v433_v12  ;;  %v1652_v14 = vpop.f32.mrb[9].mxu1  ;;  %v1893_v12 = vld [vmem:[#allocation2 + $0x218] sm:$0xff]  }
 0x385   :  { %v436_v15 = vpop.f32.mrb[10].mxu1  ;;  %v1895_v14 = vld [vmem:[#allocation2 + $0x228] sm:$0xff]  }
 0x386   :  { %v437_v16 = vadd.f32 %v1412_v11, %v436_v15  ;;  %v1653_v17 = vpop.f32.mrb[11].mxu1  ;;  %v440_v18 = vmax.f32 %v434_v13, 0.0  ;;  %v1892_v11 = vld [vmem:[#allocation2 + $0x210] sm:$0xff]   ;;  %v1894_v13 = vld [vmem:[#allocation2 + $0x220] sm:$0xff]  }
 0x387   :  { %v1896_v15 = vld [vmem:[#allocation2 + $0x230] sm:$0xff]   ;;  %v1898_v17 = vld [vmem:[#allocation2 + $0x240] sm:$0xff]  }
 0x388   :  { %v441_v19 = vmax.f32 %v437_v16, 0.0  ;;  %v1897_v16 = vld [vmem:[#allocation2 + $0x238] sm:$0xff]  }
 0x38a   :  { %v458_v20 = vpack.c.bf16 %v441_v19, %v440_v18  ;;  %v1899_v18 = vld [vmem:[#allocation2 + $0x248] sm:$0xff]   ;;  %v1900_v19 = vld [vmem:[#allocation2 + $0x250] sm:$0xff]  }
 0x38c   :  { %1671 = vmatmul.mubr.bf16.vlgmr.msra.gmra.mrb[4].mxu0 %v458_v20  ;;  %v1901_v20 = vld [vmem:[#allocation2 + $0x258] sm:$0xff]  }
 0x38d   :  { %1698 = vmatprep.mubr.msk.f32.mxu0 %vm1944_vm0, %v1943_v0 }
 0x45f   :  { %v546_v24 = vpop.f32.mrb[4].mxu0 }
 0x460   :  { %v547_v25 = vadd.f32 %v1421_v23, %v546_v24  ;;  %v1672_v26 = vpop.f32.mrb[5].mxu0  ;;  %v1905_v24 = vld [vmem:[#allocation2 + $0x278] sm:$0xff]  }
 0x461   :  { %v549_v27 = vpop.f32.mrb[6].mxu0 }
 0x462   :  { %v550_v28 = vadd.f32 %v1421_v23, %v549_v27  ;;  %v1673_v29 = vpop.f32.mrb[7].mxu0  ;;  %v553_v30 = vmax.f32 %v547_v25, 0.0  ;;  %v1904_v23 = vld [vmem:[#allocation2 + $0x270] sm:$0xff]  }
 0x464   :  { %v554_v31 = vmax.f32 %v550_v28, 0.0 }
 0x466   :  { %v571_v32 = vpack.c.bf16 %v554_v31, %v553_v30  ;;  %v1466_v30 = vld [vmem:[%s2146_s3 + $0x7] ss:$0 sm:$0xff] }
 0x468   :  { %1691 = vmatmul.mubr.bf16.vlgmr.msra.gmra.mrb[12].mxu1 %v571_v32 }
 0x469   :  { %1744 = vmatprep.mubr.msk.bf16.mxu1 %vm1944_vm0, %v1943_v0  ;;  %1729 = vmatpush3.bf16.msra.mxu1 %v1876_v52 }
 0x46a   :  { %1730 = vmatprep.subr.bf16.mxu1 %v1943_v0 }
 0x46d   :  { %1731 = vmatpush3.bf16.msra.mxu1 %v1878_v53 }
 0x46e   :  { %1732 = vmatprep.subr.bf16.mxu1 %v1943_v0 }
 0x471   :  { %1733 = vmatpush3.bf16.msra.mxu1 %v1880_v54 }
 0x472   :  { %1734 = vmatprep.subr.bf16.mxu1 %v1943_v0 }
 0x475   :  { %1735 = vmatpush3.bf16.msra.mxu1 %v1882_v55 }
 0x476   :  { %1736 = vmatprep.subr.bf16.mxu1 %v1943_v0 }
 0x479   :  { %1737 = vmatpush3.bf16.msra.mxu1 %v1884_v56 }
 0x47a   :  { %1738 = vmatprep.subr.bf16.mxu1 %v1943_v0 }
 0x47d   :  { %1739 = vmatpush3.bf16.msra.mxu1 %v1886_v57 }
 0x47e   :  { %1740 = vmatprep.subr.bf16.mxu1 %v1943_v0 }
 0x481   :  { %1741 = vmatpush3.bf16.msra.mxu1 %v1888_v58 }
 0x482   :  { %1742 = vmatprep.subr.bf16.mxu1 %v1943_v0 }
 0x485   :  { %1743 = vmatpush3.bf16.msra.mxu1 %v1890_v59 }
 0x486   :  { %1788 = vmatprep.subr.bf16.mxu1 %v1943_v0 }
 0x53b   :  { %v659_v35 = vpop.f32.mrb[12].mxu1 }
 0x53c   :  { %v1692_v36 = vpop.f32.mrb[13].mxu1  ;;  %v660_v38 = vadd.f32 %v1430_v34, %v659_v35 }
 0x53d   :  { %v662_v37 = vpop.f32.mrb[14].mxu1 }
 0x53e   :  { %v663_v39 = vadd.f32 %v1430_v34, %v662_v37  ;;  %v1693_v40 = vpop.f32.mrb[15].mxu1 }
 0x53f   :  { %v1441_v40 = vld [vmem:[%s2146_s3 + $0x6] ss:$0 sm:$0xff] }
 0x540   :  { %v1809_v41 = vpack.c.bf16 %v663_v39, %v660_v38  ;;  %v1906_v38 = vld [vmem:[#allocation2 + $0x280] sm:$0xff]   ;;  %v1907_v39 = vld [vmem:[#allocation2 + $0x288] sm:$0xff]  }
 0x542   :  { %1810 = vmatpush3.bf16.msra.mxu0 %v1809_v41  ;;  %v1467_v41 = vld [vmem:[%s2146_s3 + $0x8] ss:$0 sm:$0xff] }
 0x543   :  { %1811 = vmatprep.subr.bf16.mxu0 %v1945_v33 }
 0x545   :  { %1699 = vmatmul.mubr.msk.f32.vlgmr.msra.gmra.mrb[8].mxu0 %vm667_vm2, %v666_v42  ;;  %v1814_v42 = vadd.f32 %v1467_v41, %v1441_v40 }
 0x546   :  { %1813 = vmatpush3.bf16.msra.mxu0 %v2042_v2  ;;  %1705 = vmatprep.mubr.msk.f32.mxu0 %vm1944_vm0, %v1943_v0 }
 0x547   :  { %1708 = vmatprep.subr.bf16.mxu0 %v1943_v0 }
 0x549   :  { %1706 = vmatmul.mubr.msk.f32.vlgmr.msra.gmra.mrb[10].mxu0 %vm667_vm2, %v741_v43 }
 0x54a   :  { %1709 = vmatpush3.bf16.msra.mxu0 %v1868_v44  ;;  %1724 = vmatprep.mubr.msk.bf16.mxu0 %vm1944_vm0, %v1943_v0 }
 0x54b   :  { %1710 = vmatprep.subr.bf16.mxu0 %v1943_v0 }
 0x54e   :  { %1711 = vmatpush3.bf16.msra.mxu0 %v1869_v45 }
 0x54f   :  { %1712 = vmatprep.subr.bf16.mxu0 %v1943_v0 }
 0x552   :  { %1713 = vmatpush3.bf16.msra.mxu0 %v1870_v46 }
 0x553   :  { %1714 = vmatprep.subr.bf16.mxu0 %v1943_v0 }
 0x556   :  { %1715 = vmatpush3.bf16.msra.mxu0 %v1871_v47 }
 0x557   :  { %1716 = vmatprep.subr.bf16.mxu0 %v1943_v0 }
 0x55a   :  { %1717 = vmatpush3.bf16.msra.mxu0 %v1872_v48 }
 0x55b   :  { %1718 = vmatprep.subr.bf16.mxu0 %v1943_v0 }
 0x55e   :  { %1719 = vmatpush3.bf16.msra.mxu0 %v1873_v49 }
 0x55f   :  { %1720 = vmatprep.subr.bf16.mxu0 %v1943_v0 }
 0x562   :  { %1721 = vmatpush3.bf16.msra.mxu0 %v1874_v50 }
 0x563   :  { %1722 = vmatprep.subr.bf16.mxu0 %v1943_v0 }
 0x566   :  { %1723 = vmatpush3.bf16.msra.mxu0 %v1875_v51  ;;  %v1476_v51 = vld [vmem:[%s2146_s3 + $0x9] ss:$0 sm:$0xff] }
 0x567   :  { %1748 = vmatprep.subr.bf16.mxu0 %v1943_v0 }
 0x618   :  { %v2094_v60 = vpop.f32.mrb[8].mxu0 }
 0x619   :  { %v830_v62 = vpack.c.bf16 %v2094_v60, %v2094_v60  ;;  %v1700_v63 = vpop.f32.mrb[9].mxu0 }
 0x61b   :  { %1725 = vmatmul.mubr.bf16.vlgmr.msra.gmra.mrb[12].mxu0 %v830_v62 }
 0x61c   :  { %1749 = vmatpush3.bf16.msra.mxu0 %v1877_v61  ;;  %v810_v2 = vpop.f32.mrb[10].mxu0  ;;  %1764 = vmatprep.mubr.msk.bf16.mxu0 %vm1944_vm0, %v1943_v0  ;;  %v1362_v61 = vlaneseq }
 0x61d   :  { %1750 = vmatprep.subr.bf16.mxu0 %v1943_v0  ;;  %v956_v3 = vpack.c.bf16 %v810_v2, %v810_v2  ;;  %v1707_v4 = vpop.f32.mrb[11].mxu0 }
 0x61e   :  { %v1363_v2 = vand.u32 127, %v1362_v61 }
 0x61f   :  { %1745 = vmatmul.mubr.bf16.vlgmr.msra.gmra.mrb[16].mxu1 %v956_v3 }
 0x620   :  { %1751 = vmatpush3.bf16.msra.mxu0 %v1879_v1  ;;  %1804 = vmatprep.mubr.msk.bf16.mxu1 %vm1944_vm0, %v1943_v0  ;;  %vm1380_vm3 = vcmp.lt.s32.totalorder %v1363_v2, 80  ;;  %vm1379_vm4 = vcmp.lt.s32.totalorder %v1363_v2, 48  ;;  %vm1372_vm5 = vcmp.lt.s32.totalorder %v1363_v2, 16 }
 0x621   :  { %1752 = vmatprep.subr.bf16.mxu0 %v1943_v0  ;;  %1789 = vmatpush3.bf16.msra.mxu1 %v1900_v19 }
 0x622   :  { %1790 = vmatprep.subr.bf16.mxu1 %v1943_v0 }
 0x624   :  { %1753 = vmatpush3.bf16.msra.mxu0 %v1881_v5 }
 0x625   :  { %1754 = vmatprep.subr.bf16.mxu0 %v1943_v0  ;;  %1791 = vmatpush3.bf16.msra.mxu1 %v1901_v20 }
 0x626   :  { %1792 = vmatprep.subr.bf16.mxu1 %v1943_v0 }
 0x628   :  { %1755 = vmatpush3.bf16.msra.mxu0 %v1883_v6 }
 0x629   :  { %1756 = vmatprep.subr.bf16.mxu0 %v1943_v0  ;;  %1793 = vmatpush3.bf16.msra.mxu1 %v1902_v21 }
 0x62a   :  { %1794 = vmatprep.subr.bf16.mxu1 %v1943_v0 }
 0x62c   :  { %1757 = vmatpush3.bf16.msra.mxu0 %v1885_v7 }
 0x62d   :  { %1758 = vmatprep.subr.bf16.mxu0 %v1943_v0  ;;  %1795 = vmatpush3.bf16.msra.mxu1 %v1903_v22 }
 0x62e   :  { %1796 = vmatprep.subr.bf16.mxu1 %v1943_v0 }
 0x630   :  { %1759 = vmatpush3.bf16.msra.mxu0 %v1887_v8 }
 0x631   :  { %1760 = vmatprep.subr.bf16.mxu0 %v1943_v0  ;;  %1797 = vmatpush3.bf16.msra.mxu1 %v1904_v23 }
 0x632   :  { %1798 = vmatprep.subr.bf16.mxu1 %v1943_v0 }
 0x634   :  { %1761 = vmatpush3.bf16.msra.mxu0 %v1889_v9 }
 0x635   :  { %1762 = vmatprep.subr.bf16.mxu0 %v1943_v0  ;;  %1799 = vmatpush3.bf16.msra.mxu1 %v1905_v24 }
 0x636   :  { %1800 = vmatprep.subr.bf16.mxu1 %v1943_v0 }
 0x638   :  { %1763 = vmatpush3.bf16.msra.mxu0 %v1891_v10 }
 0x639   :  { %1768 = vmatprep.subr.bf16.mxu0 %v1943_v0  ;;  %1801 = vmatpush3.bf16.msra.mxu1 %v1906_v38 }
 0x63a   :  { %1802 = vmatprep.subr.bf16.mxu1 %v1943_v0 }
 0x63b   :  { %1765 = vmatmul.mubr.bf16.vlgmr.msra.gmra.mrb[16].mxu0 %v830_v62 }
 0x63c   :  { %1769 = vmatpush3.bf16.msra.mxu0 %v1892_v11  ;;  %1784 = vmatprep.mubr.msk.bf16.mxu0 %vm1944_vm0, %v1943_v0 }
 0x63d   :  { %1770 = vmatprep.subr.bf16.mxu0 %v1943_v0  ;;  %1803 = vmatpush3.bf16.msra.mxu1 %v1907_v39 }
 0x640   :  { %1771 = vmatpush3.bf16.msra.mxu0 %v1893_v12 }
 0x641   :  { %1772 = vmatprep.subr.bf16.mxu0 %v1943_v0 }
 0x644   :  { %1773 = vmatpush3.bf16.msra.mxu0 %v1894_v13 }
 0x645   :  { %1774 = vmatprep.subr.bf16.mxu0 %v1943_v0 }
 0x648   :  { %1775 = vmatpush3.bf16.msra.mxu0 %v1895_v14 }
 0x649   :  { %1776 = vmatprep.subr.bf16.mxu0 %v1943_v0 }
 0x64c   :  { %1777 = vmatpush3.bf16.msra.mxu0 %v1896_v15 }
 0x64d   :  { %1778 = vmatprep.subr.bf16.mxu0 %v1943_v0 }
 0x650   :  { %1779 = vmatpush3.bf16.msra.mxu0 %v1897_v16 }
 0x651   :  { %1780 = vmatprep.subr.bf16.mxu0 %v1943_v0 }
 0x654   :  { %1781 = vmatpush3.bf16.msra.mxu0 %v1898_v17 }
 0x655   :  { %1782 = vmatprep.subr.bf16.mxu0 %v1943_v0  ;;  %v1485_v0 = vmul.f32 -1.442695, %v2094_v60 }
 0x657   :  { %1908 = vpow2.f32 %v1485_v0 }
 0x658   :  { %1783 = vmatpush3.bf16.msra.mxu0 %v1899_v18 }
 0x661   :  { %v1909_v50 = vpop.eup %1908 }
 0x662   :  { %v1367_v52 = vadd.f32 1.0, %v1909_v50 }
 0x664   :  { %1910 = vrcp.f32 %v1367_v52 }
 0x66e   :  { %v1911_v59 = vpop.eup %1910 }
 0x66f   :  { %v1370_v1 = vmul.f32 0.9, %v1911_v59 }
 0x671   :  { %v1371_v3 = vadd.f32 0.1, %v1370_v1 }
 0x673   :  { %v1381_v4 = vsel %vm1380_vm3, %v1371_v3, 0.0 }
 0x674   :  { %v1382_v6 = vsel %vm1379_vm4, %v2094_v60, %v1381_v4 }
 0x6f2   :  { %v1039_v25 = vpop.f32.mrb[16].mxu1 }
 0x6f3   :  { %v1746_v26 = vpop.f32.mrb[17].mxu1 }
 0x6f4   :  { %v1042_v27 = vpop.f32.mrb[18].mxu1 }
 0x6f5   :  { %v1747_v28 = vpop.f32.mrb[19].mxu1 }
 0x70e   :  { %v1127_v29 = vpop.f32.mrb[16].mxu0 }
 0x70f   :  { %v1128_v31 = vadd.f32 %v1127_v29, %v1039_v25  ;;  %v1766_v32 = vpop.f32.mrb[17].mxu0 }
 0x710   :  { %v1130_v33 = vpop.f32.mrb[18].mxu0 }
 0x711   :  { %v1138_v34 = vadd.f32 %v1466_v30, %v1128_v31  ;;  %v1767_v35 = vpop.f32.mrb[19].mxu0 }
 0x713   :  { %v1139_v36 = vmax.f32 %v1138_v34, 0.0 }
 0x715   :  { %v1156_v37 = vpack.c.bf16 %v1139_v36, %v1139_v36 }
 0x717   :  { %1785 = vmatmul.mubr.bf16.vlgmr.msra.gmra.mrb[12].mxu0 %v1156_v37 }
 0x7ea   :  { %v1244_v43 = vpop.f32.mrb[12].mxu0 }
 0x7eb   :  { %v1815_v44 = vadd.f32 %v1814_v42, %v1244_v43  ;;  %v1786_v45 = vpop.f32.mrb[13].mxu0 }
 0x7ec   :  { %v1247_v46 = vpop.f32.mrb[14].mxu0 }
 0x7ed   :  { %v1251_v47 = vmax.f32 %v1815_v44, 0.0  ;;  %v1787_v48 = vpop.f32.mrb[15].mxu0 }
 0x7ef   :  { %v1268_v49 = vpack.c.bf16 %v1251_v47, %v1251_v47 }
 0x7f1   :  { %1805 = vmatmul.mubr.bf16.vlgmr.msra.gmra.mrb[20].mxu1 %v1268_v49 }
 0x8c4   :  { %v1356_v53 = vpop.f32.mrb[20].mxu1 }
 0x8c5   :  { %v1357_v54 = vadd.f32 %v1476_v51, %v1356_v53  ;;  %v1806_v55 = vpop.f32.mrb[21].mxu1 }
 0x8c6   :  { %v1359_v56 = vpop.f32.mrb[22].mxu1 }
 0x8c7   :  { %v1486_v57 = vmul.f32 -1.442695, %v1357_v54  ;;  %v1807_v58 = vpop.f32.mrb[23].mxu1 }
 0x8c9   :  { %1912 = vpow2.f32 %v1486_v57 }
 0x8d3   :  { %v1913_v62 = vpop.eup %1912 }
 0x8d4   :  { %v1376_v63 = vadd.f32 1.0, %v1913_v62 }
 0x8d6   :  { %1914 = vrcp.f32 %v1376_v63 }
 0x8e0   :  { %v1915_v5 = vpop.eup %1914 }
 0x8e1   :  { %v1383_v7 = vsel %vm1372_vm5, %v1915_v5, %v1382_v6 }
 0x8e2   :  { %1384 = vst [vmem:[%s2147_s4] sm:$0x3] %v1383_v7 }
 0x8e3   :  { %1389 = vsyncpa [#allocation3], 1 }

</bundles_post_ra>
